<compile_context>
chip_gen: v7x
topology: tpu7x:2x2x1
jax: 0.10.0
libtpu: 0.0.40
codegen_flags: <defaults>
</compile_context>

<pallas_src>
import jax
import jax.numpy as jnp
from jax import lax
from jax.experimental import pallas as pl
from jax.experimental.pallas import tpu as pltpu


def _make_conv_kernel(kh, kw, stride, cin_pad, ws, l_out):
    """Per-image conv+bias+ReLU kernel: stack taps along K, one GEMM, bias, ReLU."""

    def kernel(x_ref, w_ref, b_ref, o_ref, stk_ref):
        # x_ref:   (1, s, s, Cin_pad, Lflat)  zero-padded, (phase-decomposed,) row-flat image
        # w_ref:   (Cout, kh*kw*Cin_pad)      taps stacked along the contraction dim
        # b_ref:   (Cout, 1)                  bias column
        # o_ref:   (1, Cout, L)               L = Ho * Ws  (lane-dense output block)
        # stk_ref: (kh*kw*Cin_pad, L)         VMEM scratch: stacked shifted windows
        for di in range(kh):
            for dj in range(kw):
                ri, qi = di % stride, di // stride      # phase / coarse row shift
                rj, qj = dj % stride, dj // stride      # phase / coarse col shift
                off = qi * ws + qj                      # static lane offset of this tap
                t = di * kw + dj
                # (Cin_pad, L) shifted window: channels on sublanes, spatial on lanes.
                stk_ref[pl.ds(t * cin_pad, cin_pad), :] = \
                    x_ref[0, ri, rj, :, pl.ds(off, l_out)]
        # Single MXU GEMM: (Cout, K) x (K, L) -> (Cout, L), K = kh*kw*Cin_pad.
        acc = lax.dot_general(
            w_ref[...], stk_ref[...], (((1,), (0,)), ((), ())),
            preferred_element_type=jnp.float32)
        acc = acc + b_ref[...]                          # (Cout, 1) broadcast over lanes
        o_ref[0] = jnp.maximum(acc, 0.0).astype(o_ref.dtype)

    return kernel


def conv2d_block_forward(x, weight, bias, *, stride, padding):
    """Conv2dBlock forward: ZeroPad2d(padding) -> Conv2d(stride, bias) -> ReLU.

    x:      (N, Cin, H, W)   float32
    weight: (Cout, Cin, kh, kw)
    bias:   (Cout,)
    returns (N, Cout, Ho, Wo)
    """
    n, cin, h, w = x.shape
    cout, cin_w, kh, kw = weight.shape
    assert cin == cin_w
    s = stride

    ho = (h + 2 * padding - kh) // s + 1
    wo = (w + 2 * padding - kw) // s + 1
    cin_pad = -(-cin // 8) * 8                      # sublane-aligned channel count

    # ---- input prep: O(input)-size layout only (no im2col blow-up) ----
    if s == 1:
        # Fast path: single pad + reshape, channels stay leading (sublane side).
        hp, wp = h + 2 * padding, w + 2 * padding
        ws = wp
        l_out = ho * ws
        max_off = (kh - 1) * ws + (kw - 1)
        hp_tot = max(hp, -(-(max_off + l_out) // ws))   # extra zero rows for last tap
        l_flat = hp_tot * ws
        xph = jnp.pad(x, ((0, 0), (0, cin_pad - cin),
                          (padding, padding + (hp_tot - hp)),
                          (padding, padding)))
        xph = xph.reshape(n, 1, 1, cin_pad, l_flat)
    else:
        # General stride: phase decomposition, channels kept on the sublane side.
        hp, wp = h + 2 * padding, w + 2 * padding
        hp2 = -(-hp // s) * s
        wp2 = -(-wp // s) * s
        hs, ws = hp2 // s, wp2 // s
        l_out = ho * ws
        max_off = ((kh - 1) // s) * ws + (kw - 1) // s
        l_flat = max(hs * ws, max_off + l_out)
        xp = jnp.pad(x, ((0, 0), (0, 0),
                         (padding, padding + (hp2 - hp)),
                         (padding, padding + (wp2 - wp))))
        # (N, Cin, Hs, s, Ws, s) -> (N, s, s, Cin, Hs, Ws) -> (N, s, s, Cin, Hs*Ws)
        xph = xp.reshape(n, cin, hs, s, ws, s).transpose(0, 3, 5, 1, 2, 4)
        xph = xph.reshape(n, s, s, cin, hs * ws)
        xph = jnp.pad(xph, ((0, 0), (0, 0), (0, 0),
                            (0, cin_pad - cin), (0, l_flat - hs * ws)))

    # Shifted-window trick invariant: a tap may wrap from one output row into the
    # next only inside the (ws - wo) garbage columns that get sliced off afterwards.
    assert wo + (kw - 1) // s <= ws, \
        "tap window would wrap into valid output columns for this kernel/stride/padding"

    # Weights stacked to match scratch row order: row = (di*kw + dj)*Cin_pad + c.
    k_dim = kh * kw * cin_pad
    w_mat = jnp.transpose(weight, (0, 2, 3, 1))                 # (Cout, kh, kw, Cin)
    w_mat = jnp.pad(w_mat, ((0, 0), (0, 0), (0, 0), (0, cin_pad - cin)))
    w_mat = w_mat.reshape(cout, k_dim)
    b_col = bias.reshape(cout, 1)

    kernel = _make_conv_kernel(kh, kw, s, cin_pad, ws, l_out)

    out_flat = pl.pallas_call(
        kernel,
        out_shape=jax.ShapeDtypeStruct((n, cout, l_out), x.dtype),
        grid_spec=pltpu.PrefetchScalarGridSpec(
            num_scalar_prefetch=0,
            grid=(n,),                                          # N=2: even -> both v7x TCs busy
            in_specs=[
                # whole flattened image of batch element i; fetched once per step
                pl.BlockSpec((1, s, s, cin_pad, l_flat), lambda i: (i, 0, 0, 0, 0)),
                # weights / bias: constant index_map -> VMEM-resident across the grid
                pl.BlockSpec((cout, k_dim), lambda i: (0, 0)),
                pl.BlockSpec((cout, 1), lambda i: (0, 0)),
            ],
            out_specs=pl.BlockSpec((1, cout, l_out), lambda i: (i, 0, 0)),
            scratch_shapes=[pltpu.VMEM((k_dim, l_out), jnp.float32)],
        ),
        compiler_params=pltpu.CompilerParams(
            dimension_semantics=("parallel",)),
    )(xph, w_mat, b_col)

    # (N, Cout, Ho*Ws) -> (N, Cout, Ho, Ws) -> drop the garbage columns -> NCHW
    out = out_flat.reshape(n, cout, ho, ws)[:, :, :, :wo]
    return out


if __name__ == "__main__":
    # Conv2dBlock(input_dim=4, output_dim=8, kernel_size=3, stride=1, padding=1,
    #             norm='none', activation='relu', pad_type='zero')
    N, CIN, H, W = 2, 4, 16, 16
    COUT, KH, KW = 8, 3, 3
    STRIDE, PADDING = 1, 1

    key = jax.random.PRNGKey(0)
    kx, kw_, kb = jax.random.split(key, 3)
    x = jax.random.normal(kx, (N, CIN, H, W), dtype=jnp.float32)
    fan_in = CIN * KH * KW
    bound = 1.0 / (fan_in ** 0.5)
    weight = jax.random.uniform(kw_, (COUT, CIN, KH, KW),
                                minval=-bound, maxval=bound, dtype=jnp.float32)
    bias = jax.random.uniform(kb, (COUT,),
                              minval=-bound, maxval=bound, dtype=jnp.float32)

    out = conv2d_block_forward(x, weight, bias, stride=STRIDE, padding=PADDING)
    out = jax.block_until_ready(out)

    # reference: XLA conv (zero pad) + bias + relu
    ref = jax.lax.conv_general_dilated(
        x, weight, window_strides=(STRIDE, STRIDE),
        padding=[(PADDING, PADDING), (PADDING, PADDING)],
        dimension_numbers=("NCHW", "OIHW", "NCHW"))
    ref = jnp.maximum(ref + bias[None, :, None, None], 0.0)
    assert out.shape == (N, COUT, H, W), out.shape
    assert jnp.allclose(out, ref, atol=1e-4, rtol=1e-4), \
        float(jnp.max(jnp.abs(out - ref)))

    print("KERNEL_OK")
</pallas_src>

<mosaic_0001>
module attributes {stable_mosaic.version = 11 : i64} {
  func.func @kernel(%arg0: i32, %arg1: memref<1x1x1x8x342xf32, #tpu.memory_space<vmem>>, %arg2: memref<8x72xf32, #tpu.memory_space<vmem>>, %arg3: memref<8x1xf32, #tpu.memory_space<vmem>>, %arg4: memref<1x8x288xf32, #tpu.memory_space<vmem>>, %arg5: memref<72x288xf32, #tpu.memory_space<vmem>>) attributes {dimension_semantics = [#tpu.dimension_semantics<parallel>], iteration_bounds = array<i64: 2>, scalar_prefetch = 0 : i64, scratch_operands = 1 : i64, tpu.core_type = #tpu.core_type<tc>, window_params = [{transform_indices = @transform_0, window_bounds = array<i64: 1, 1, 1, 8, 342>}, {pipeline_mode = #tpu.pipeline_mode<synchronous>, transform_indices = @transform_1, window_bounds = array<i64: 8, 72>}, {pipeline_mode = #tpu.pipeline_mode<synchronous>, transform_indices = @transform_2, window_bounds = array<i64: 8, 1>}, {transform_indices = @transform_3, window_bounds = array<i64: 1, 8, 288>}]} {
    %c0 = arith.constant 0 : index
    %c0_0 = arith.constant 0 : index
    %c0_1 = arith.constant 0 : index
    %c0_2 = arith.constant 0 : index
    %c0_3 = arith.constant 0 : index
    %0 = vector.load %arg1[%c0, %c0_0, %c0_1, %c0_2, %c0_3] : memref<1x1x1x8x342xf32, #tpu.memory_space<vmem>>, vector<1x1x1x8x288xf32>
    %1 = vector.shape_cast %0 : vector<1x1x1x8x288xf32> to vector<8x288xf32>
    %c0_4 = arith.constant 0 : index
    %c0_5 = arith.constant 0 : index
    %2 = vector.load %arg5[%c0_4, %c0_5] : memref<72x288xf32, #tpu.memory_space<vmem>>, vector<8x288xf32>
    tpu.vector_store %arg5[%c0_4, %c0_5], %1 {strides = array<i32>} : memref<72x288xf32, #tpu.memory_space<vmem>>, vector<8x288xf32>,
    %c0_6 = arith.constant 0 : index
    %c0_7 = arith.constant 0 : index
    %c0_8 = arith.constant 0 : index
    %c0_9 = arith.constant 0 : index
    %c1 = arith.constant 1 : index
    %3 = vector.load %arg1[%c0_6, %c0_7, %c0_8, %c0_9, %c1] : memref<1x1x1x8x342xf32, #tpu.memory_space<vmem>>, vector<1x1x1x8x288xf32>
    %4 = vector.shape_cast %3 : vector<1x1x1x8x288xf32> to vector<8x288xf32>
    %c8 = arith.constant 8 : index
    %c0_10 = arith.constant 0 : index
    %5 = vector.load %arg5[%c8, %c0_10] : memref<72x288xf32, #tpu.memory_space<vmem>>, vector<8x288xf32>
    tpu.vector_store %arg5[%c8, %c0_10], %4 {strides = array<i32>} : memref<72x288xf32, #tpu.memory_space<vmem>>, vector<8x288xf32>,
    %c0_11 = arith.constant 0 : index
    %c0_12 = arith.constant 0 : index
    %c0_13 = arith.constant 0 : index
    %c0_14 = arith.constant 0 : index
    %c2 = arith.constant 2 : index
    %6 = vector.load %arg1[%c0_11, %c0_12, %c0_13, %c0_14, %c2] : memref<1x1x1x8x342xf32, #tpu.memory_space<vmem>>, vector<1x1x1x8x288xf32>
    %7 = vector.shape_cast %6 : vector<1x1x1x8x288xf32> to vector<8x288xf32>
    %c16 = arith.constant 16 : index
    %c0_15 = arith.constant 0 : index
    %8 = vector.load %arg5[%c16, %c0_15] : memref<72x288xf32, #tpu.memory_space<vmem>>, vector<8x288xf32>
    tpu.vector_store %arg5[%c16, %c0_15], %7 {strides = array<i32>} : memref<72x288xf32, #tpu.memory_space<vmem>>, vector<8x288xf32>,
    %c0_16 = arith.constant 0 : index
    %c0_17 = arith.constant 0 : index
    %c0_18 = arith.constant 0 : index
    %c0_19 = arith.constant 0 : index
    %c18 = arith.constant 18 : index
    %9 = vector.load %arg1[%c0_16, %c0_17, %c0_18, %c0_19, %c18] : memref<1x1x1x8x342xf32, #tpu.memory_space<vmem>>, vector<1x1x1x8x288xf32>
    %10 = vector.shape_cast %9 : vector<1x1x1x8x288xf32> to vector<8x288xf32>
    %c24 = arith.constant 24 : index
    %c0_20 = arith.constant 0 : index
    %11 = vector.load %arg5[%c24, %c0_20] : memref<72x288xf32, #tpu.memory_space<vmem>>, vector<8x288xf32>
    tpu.vector_store %arg5[%c24, %c0_20], %10 {strides = array<i32>} : memref<72x288xf32, #tpu.memory_space<vmem>>, vector<8x288xf32>,
    %c0_21 = arith.constant 0 : index
    %c0_22 = arith.constant 0 : index
    %c0_23 = arith.constant 0 : index
    %c0_24 = arith.constant 0 : index
    %c19 = arith.constant 19 : index
    %12 = vector.load %arg1[%c0_21, %c0_22, %c0_23, %c0_24, %c19] : memref<1x1x1x8x342xf32, #tpu.memory_space<vmem>>, vector<1x1x1x8x288xf32>
    %13 = vector.shape_cast %12 : vector<1x1x1x8x288xf32> to vector<8x288xf32>
    %c32 = arith.constant 32 : index
    %c0_25 = arith.constant 0 : index
    %14 = vector.load %arg5[%c32, %c0_25] : memref<72x288xf32, #tpu.memory_space<vmem>>, vector<8x288xf32>
    tpu.vector_store %arg5[%c32, %c0_25], %13 {strides = array<i32>} : memref<72x288xf32, #tpu.memory_space<vmem>>, vector<8x288xf32>,
    %c0_26 = arith.constant 0 : index
    %c0_27 = arith.constant 0 : index
    %c0_28 = arith.constant 0 : index
    %c0_29 = arith.constant 0 : index
    %c20 = arith.constant 20 : index
    %15 = vector.load %arg1[%c0_26, %c0_27, %c0_28, %c0_29, %c20] : memref<1x1x1x8x342xf32, #tpu.memory_space<vmem>>, vector<1x1x1x8x288xf32>
    %16 = vector.shape_cast %15 : vector<1x1x1x8x288xf32> to vector<8x288xf32>
    %c40 = arith.constant 40 : index
    %c0_30 = arith.constant 0 : index
    %17 = vector.load %arg5[%c40, %c0_30] : memref<72x288xf32, #tpu.memory_space<vmem>>, vector<8x288xf32>
    tpu.vector_store %arg5[%c40, %c0_30], %16 {strides = array<i32>} : memref<72x288xf32, #tpu.memory_space<vmem>>, vector<8x288xf32>,
    %c0_31 = arith.constant 0 : index
    %c0_32 = arith.constant 0 : index
    %c0_33 = arith.constant 0 : index
    %c0_34 = arith.constant 0 : index
    %c36 = arith.constant 36 : index
    %18 = vector.load %arg1[%c0_31, %c0_32, %c0_33, %c0_34, %c36] : memref<1x1x1x8x342xf32, #tpu.memory_space<vmem>>, vector<1x1x1x8x288xf32>
    %19 = vector.shape_cast %18 : vector<1x1x1x8x288xf32> to vector<8x288xf32>
    %c48 = arith.constant 48 : index
    %c0_35 = arith.constant 0 : index
    %20 = vector.load %arg5[%c48, %c0_35] : memref<72x288xf32, #tpu.memory_space<vmem>>, vector<8x288xf32>
    tpu.vector_store %arg5[%c48, %c0_35], %19 {strides = array<i32>} : memref<72x288xf32, #tpu.memory_space<vmem>>, vector<8x288xf32>,
    %c0_36 = arith.constant 0 : index
    %c0_37 = arith.constant 0 : index
    %c0_38 = arith.constant 0 : index
    %c0_39 = arith.constant 0 : index
    %c37 = arith.constant 37 : index
    %21 = vector.load %arg1[%c0_36, %c0_37, %c0_38, %c0_39, %c37] : memref<1x1x1x8x342xf32, #tpu.memory_space<vmem>>, vector<1x1x1x8x288xf32>
    %22 = vector.shape_cast %21 : vector<1x1x1x8x288xf32> to vector<8x288xf32>
    %c56 = arith.constant 56 : index
    %c0_40 = arith.constant 0 : index
    %23 = vector.load %arg5[%c56, %c0_40] : memref<72x288xf32, #tpu.memory_space<vmem>>, vector<8x288xf32>
    tpu.vector_store %arg5[%c56, %c0_40], %22 {strides = array<i32>} : memref<72x288xf32, #tpu.memory_space<vmem>>, vector<8x288xf32>,
    %c0_41 = arith.constant 0 : index
    %c0_42 = arith.constant 0 : index
    %c0_43 = arith.constant 0 : index
    %c0_44 = arith.constant 0 : index
    %c38 = arith.constant 38 : index
    %24 = vector.load %arg1[%c0_41, %c0_42, %c0_43, %c0_44, %c38] : memref<1x1x1x8x342xf32, #tpu.memory_space<vmem>>, vector<1x1x1x8x288xf32>
    %25 = vector.shape_cast %24 : vector<1x1x1x8x288xf32> to vector<8x288xf32>
    %c64 = arith.constant 64 : index
    %c0_45 = arith.constant 0 : index
    %26 = vector.load %arg5[%c64, %c0_45] : memref<72x288xf32, #tpu.memory_space<vmem>>, vector<8x288xf32>
    tpu.vector_store %arg5[%c64, %c0_45], %25 {strides = array<i32>} : memref<72x288xf32, #tpu.memory_space<vmem>>, vector<8x288xf32>,
    %c0_46 = arith.constant 0 : index
    %c0_47 = arith.constant 0 : index
    %27 = vector.load %arg2[%c0_46, %c0_47] : memref<8x72xf32, #tpu.memory_space<vmem>>, vector<8x72xf32>
    %c0_48 = arith.constant 0 : index
    %c0_49 = arith.constant 0 : index
    %28 = vector.load %arg5[%c0_48, %c0_49] : memref<72x288xf32, #tpu.memory_space<vmem>>, vector<72x288xf32>
    %cst = arith.constant dense<0.000000e+00> : vector<8x288xf32>
    %29 = tpu.matmul %27, %28, %cst {dimension_numbers = #tpu.dot_dimension_numbers<[1], [0], [0], [1], [0, 0, 1, 1], [], []>} : vector<8x72xf32>, vector<72x288xf32>, vector<8x288xf32> -> vector<8x288xf32>
    %c0_50 = arith.constant 0 : index
    %c0_51 = arith.constant 0 : index
    %30 = vector.load %arg3[%c0_50, %c0_51] : memref<8x1xf32, #tpu.memory_space<vmem>>, vector<8x1xf32>
    %31 = vector.broadcast %30 : vector<8x1xf32> to vector<8x288xf32>
    %32 = arith.addf %29, %31 : vector<8x288xf32>
    %cst_52 = arith.constant 0.000000e+00 : f32
    %33 = vector.broadcast %cst_52 : f32 to vector<8x288xf32>
    %34 = arith.maximumf %32, %33 : vector<8x288xf32>
    %c0_53 = arith.constant 0 : index
    %c0_54 = arith.constant 0 : index
    %c0_55 = arith.constant 0 : index
    %35 = vector.load %arg4[%c0_53, %c0_54, %c0_55] : memref<1x8x288xf32, #tpu.memory_space<vmem>>, vector<1x8x288xf32>
    %36 = vector.shape_cast %35 : vector<1x8x288xf32> to vector<8x288xf32>
    %37 = vector.shape_cast %34 : vector<8x288xf32> to vector<1x8x288xf32>
    tpu.vector_store %arg4[%c0_53, %c0_54, %c0_55], %37 {strides = array<i32>} : memref<1x8x288xf32, #tpu.memory_space<vmem>>, vector<1x8x288xf32>,
    return
  }
  func.func @transform_0(%arg0: i32) -> (i32, i32, i32, i32, i32) {
    %c0_i32 = arith.constant 0 : i32
    %c0_i32_0 = arith.constant 0 : i32
    %c0_i32_1 = arith.constant 0 : i32
    %c0_i32_2 = arith.constant 0 : i32
    %c0_i32_3 = arith.constant 0 : i32
    return %arg0, %c0_i32, %c0_i32_0, %c0_i32_1, %c0_i32_2 : i32, i32, i32, i32, i32
  }
  func.func @transform_1(%arg0: i32) -> (i32, i32) {
    %c0_i32 = arith.constant 0 : i32
    %c0_i32_0 = arith.constant 0 : i32
    %c0_i32_1 = arith.constant 0 : i32
    return %c0_i32, %c0_i32_0 : i32, i32
  }
  func.func @transform_2(%arg0: i32) -> (i32, i32) {
    %c0_i32 = arith.constant 0 : i32
    %c0_i32_0 = arith.constant 0 : i32
    %c0_i32_1 = arith.constant 0 : i32
    return %c0_i32, %c0_i32_0 : i32, i32
  }
  func.func @transform_3(%arg0: i32) -> (i32, i32, i32) {
    %c0_i32 = arith.constant 0 : i32
    %c0_i32_0 = arith.constant 0 : i32
    %c0_i32_1 = arith.constant 0 : i32
    return %arg0, %c0_i32, %c0_i32_0 : i32, i32, i32
  }
}

</mosaic_0001>

<bundles_post_ra>
// kernel: tpu_custom_call.1
= control target key start
LH: loop header
LB: loop body
LE: loop exit
PB: predicated region body
PF: predicated region fallthrough
CT: control target
= control target key end

     0   :  { %8 = vsyncpa [#allocation4], 0  ;;  %s1084_s0 = inlined_call_operand.hbm [shape: f32[2,1,1,8,342], index: 0, kind: input, shape index: {}]   ;;  %s1085_s1 = inlined_call_operand.vmem [shape: f32[8,72], index: 1, kind: input, shape index: {}]   ;;  %s1086_s2 = inlined_call_operand.vmem [shape: f32[8,1], index: 2, kind: input, shape index: {}]   ;;  %s1087_s3 = inlined_call_operand.hbm [shape: f32[2,8,288], index: 3, kind: output, shape index: {}]  }
   0x1   :  { %10 = vsyncpa [#allocation4 + $0x1], 0 }
   0x2   :  { %11 = vsyncpa [#allocation5], 0 }
   0x3   :  { %13 = vsyncpa [#allocation5 + $0x1], 0  ;;  %s896_s12 = smov 0   ;;  %s898_s13 = smov 0  }
   0x4   :  { %s900_s14 = smov 0   ;;  %s902_s15 = smov 0  }
   0x5 LB: > { %s917_s16 = sadd.s32 4294967295, %s860_s15   ;;  %s632_s17 = sadd.s32 4294967294, %s860_s15   ;;  %s860_s15 = sphi %s902_s15, %s1101_s15   ;;  %s856_s14 = sphi %s900_s14, %s1100_s14   ;;  %s852_s13 = sphi %s898_s13, %s1099_s13   ;;  %s848_s12 = sphi %s896_s12, %s1098_s12  }
   0x6   : > { %s921_s18 = sadd.s32 1, %s860_s15   ;;  %s26_s19 = sadd.s32 1, %s856_s14 }
   0x7   : > { %s23_s20 = ssub.s32 %s860_s15, %s921_s18  ;;  %p33_p0 = scmp.ne.s32.totalorder %s856_s14, %s852_s13 }
   0x8   : > { %p24_p1 = scmp.eq.s32.totalorder %s23_s20, 0  ;;  %p34_p2 = scmp.eq.s32.totalorder %s860_s15, 0 }
   0x9   : > { %p39_p3 = scmp.ne.s32.totalorder %s852_s13, %s848_s12  ;;  %p40_p4 = scmp.eq.s32.totalorder %s917_s16, 0 }
   0xa   : > { %s933_s21 = scalar_select %p24_p1, %s856_s14, %s26_s19  }
   0xb   : > { %p35_p5 = por %p34_p2, %p33_p0  ;;  %p935_p6 = por %p40_p4, %p39_p3 }
   0xc   : > { %p105_p7 = scmp.eq.s32.totalorder %s917_s16, 1  ;;  %p111_p8 = scmp.eq.s32.totalorder %s632_s17, 1 }
   0xd   : > { %p717_p10 = scmp.lt.s32.totalorder %s860_s15, 2  ;;  %s137_s25 = sand.u32 1, %s856_s14  }
   0xe   : > { %p942_p11 = por %p105_p7, %p33_p0  ;;  %p946_p12 = por %p111_p8, %p39_p3 }
   0xf   : > { %s702_s26 = smul.u32 384, %s860_s15  ;;  %p957_p13 = pnand %p717_p10, %p35_p5 }
  0x10   : > { %s1090_s23 = scalar_select %p942_p11, 1, 0 }
  0x11   : > { %s1091_s24 = scalar_select %p946_p12, 1, 0 }
  0x12   : > { %s701_s27 = smul.u32 24, %s137_s25  ;;  %s955_s30 = scalar_lea.hbm %s1084_s0, %s702_s26 }
  0x13   : > { %s138_s7 = scalar_lea.sflag [#allocation4], %s137_s25  ;;  %s764_s8 = scalar_lea.hbm %s955_s30, 384 }
  0x14   : > { %s141_s5 = scalar_lea.vmem [#allocation3], %s701_s27  ;;  %p765_p2 = scmp.ne.s32.totalorder %s955_s30, %s764_s8 }
  0x15   : > { %s149_s6 = sshll.u32 %s141_s5, 4  ;;  %p766_p3 = pneg %p957_p13  ;;  %s962_s6 = int_to_ptr.vmem [resolvable:$true] %s149_s6 }
  0x16   : > { %s769_s11 = scalar_lea.hbm %s1084_s0, 768  ;;  %p770_p7 = scmp.lt.u32.totalorder %s955_s30, %s1084_s0 }
  0x17   : > { %p767_p4 = pnand %p766_p3, %p765_p2  ;;  %p771_p8 = scmp.lt.u32.totalorder %s769_s11, %s764_s8 }
  0x18   : > { %p773_p9 = scmp.lt.u32.totalorder %s764_s8, %s955_s30 }
  0x19   : > { %p768_p5 = pneg %p767_p4  ;;  %p772_p10 = por %p771_p8, %p770_p7 }
  0x1b   : > { %p774_p0 = por %p773_p9, %p772_p10 }
  0x1d   : > { %p775_p1 = pnand %p774_p0, %p768_p5 }
  0x1f   : > { %778 = shalt.err (!%p775_p1)
}
  0x20   : > { %s779_s20 = scalar_lea.vmem %s962_s6, 384  ;;  %s862_s25 = smov [#allocation3]  }
  0x21   : > { %p780_p2 = scmp.ne.s32.totalorder %s962_s6, %s779_s20  ;;  %s784_s26 = sshll.u32 %s862_s25, 4  ;;  %s785_s26 = int_to_ptr.vmem [resolvable:$false] %s784_s26 }
  0x22   : > { %s786_s27 = scalar_lea.vmem %s785_s26, 768  ;;  %p787_p11 = scmp.lt.s32.totalorder %s962_s6, %s785_s26 }
  0x23   : > { %p782_p4 = pnand %p780_p2, %p766_p3  ;;  %p788_p7 = scmp.lt.s32.totalorder %s786_s27, %s779_s20 }
  0x25   : > { %p783_p12 = pneg %p782_p4  ;;  %p789_p8 = por %p788_p7, %p787_p11 }
  0x27   : > { %p790_p9 = pnand %p789_p8, %p783_p12 }
  0x29   : > { %793 = shalt.err (!%p790_p9)
}
  0x2a   : > { %712 = dma.hbm_to_vmem [thread:$0]  (!%p957_p13), %s955_s30, 384, %s962_s6, %s138_s7  }
  0x2b   : > { %p1093_p0 = scmp.lt.s32.totalorder %s860_s15, 3  ;;  %p1094_p1 = scmp.ge.s32.totalorder %s860_s15, 1 }
  0x2d   : > { %p155_p3 = pnand %p1094_p1, %p1093_p0 }
  0x2e   : > { %s995_s28 = sand.u32 (!%p155_p3), 1, %s852_s13  }
  0x2f   : > { %158 = sbr.rel (%p155_p3) target bundleno = 454 (0x1c6), region = 32  ;;  %s161_s5 = scalar_lea.sflag (!%p155_p3), [#allocation4], %s995_s28 }
  0x30   : > { %s703_s29 = smul.u32 (!%p155_p3), 24, %s995_s28 }
  0x32   : > { %s164_s4 = scalar_lea.vmem (!%p155_p3), [#allocation3], %s703_s29 }
  0x36   : > { %839 = dma.done.wait (%p935_p6), %s161_s5, 384  }
  0x37   : > { %841 = vsyncadd (%p935_p6), %s161_s5, 4294966912  ;;  %vm192_vm0 = vcmask 261120   ;;  %v195_v0 = vld [vmem:[%s164_s4 + $0x8] sm:$0xff]  ;;  %v194_v1 = vld [vmem:[%s164_s4] sm:$0xff]  ;;  %s863_s30 = smov 127   ;;  %v864_v3 = vmov 0.0|0.0  }
  0x38   : > { %v196_v2 = vld [vmem:[%s164_s4 + $0x10] sm:$0xff]  ;;  %202 = vrot.lane.b32.xlu0 %v195_v0, %s863_s30  ;;  %200 = vrot.lane.b32.xlu1 %v194_v1, %s863_s30  ;;  %s865_s6 = smov 126   ;;  %s866_s7 = smov 110   ;;  %v871_v4 = vmov 0.0   ;;  %vm872_vm1 = vmmov 0   ;;  %v874_v5 = vmov 0  }
  0x39   : > { %193 = vst.msk [vmem:[#allocation2 + $0x10] sm:$0xff] %vm192_vm0, %v196_v2  ;;  %689 = vmatprep.subr.bf16.mxu1 %v864_v3  ;;  %s867_s22 = smov 109   ;;  %s868_s8 = smov 108   ;;  %464 = vmatprep.mubr.f32.mxu0 %v871_v4  ;;  %v390_v6 = vld [vmem:[%s1086_s2] sm:$0xff]  ;;  %vm206_vm2 = vcmask 1039360   ;;  %vm227_vm3 = vcmask 1031168  }
  0x3a   : > { %s869_s9 = smov 92   ;;  %s870_s10 = smov 91   ;;  %670 = vmatprep.mubr.msk.f32.mxu1 %vm872_vm1, %v871_v4  ;;  %763 = vset.pattern.permute.xlu0 %v874_v5  ;;  %vm248_vm4 = vcmask 900096   ;;  %vm269_vm5 = vcmask 891904   ;;  %vm290_vm6 = vcmask 883712   ;;  %vm311_vm7 = vcmask 752640  }
  0x3b   : > { %s873_s11 = smov 90   ;;  %vm332_vm8 = vcmask 744448   ;;  %vm353_vm9 = vcmask 736256   ;;  %vm396_vm10 = vcmask 588800   ;;  %s704_s26 = smul.u32 384, %s917_s16 }
  0x3c   : > { %204 = vrot.lane.b32.xlu0 %v196_v2, %s863_s30  ;;  %223 = vrot.lane.b32.xlu1 %v195_v0, %s865_s6  ;;  %s186_s27 = scalar_lea.vmem [#allocation6], %s703_s29  ;;  %s548_s16 = scalar_lea.sflag [#allocation5], %s995_s28 }
  0x3d   : > { %s562_s5 = sshll.u32 %s186_s27, 4  ;;  %p1095_p11 = scmp.ne.s32.totalorder %s1090_s23, 0  ;;  %s1041_s5 = int_to_ptr.vmem [resolvable:$true] %s562_s5 }
  0x3e   : > { %s794_s29 = scalar_lea.vmem %s1041_s5, 384 }
  0x3f   : > { %p795_p6 = scmp.ne.s32.totalorder %s1041_s5, %s794_s29 }
  0x40   : > { %225 = vrot.lane.b32.xlu0 %v196_v2, %s865_s6  ;;  %244 = vrot.lane.b32.xlu1 %v195_v0, %s866_s7  ;;  %v365_v18 = vld [vmem:[#allocation2 + $0x10] sm:$0xff] }
  0x41   : > { %p796_p12 = pnand %p795_p6, %p1095_p11 }
  0x43   : > { %p797_p13 = pneg %p796_p12 }
  0x44   : > { %246 = vrot.lane.b32.xlu0 %v196_v2, %s866_s7  ;;  %221 = vrot.lane.b32.xlu1 %v194_v1, %s865_s6  ;;  %s1039_s6 = scalar_lea.hbm %s1087_s3, %s704_s26 }
  0x48   : > { %242 = vrot.lane.b32.xlu0 %v194_v1, %s866_s7  ;;  %265 = vrot.lane.b32.xlu1 %v195_v0, %s867_s22  ;;  %s875_s7 = smov [#allocation6]  }
  0x4c   : > { %267 = vrot.lane.b32.xlu0 %v196_v2, %s867_s22  ;;  %286 = vrot.lane.b32.xlu1 %v195_v0, %s868_s8 }
  0x50   : > { %288 = vrot.lane.b32.xlu0 %v196_v2, %s868_s8  ;;  %263 = vrot.lane.b32.xlu1 %v194_v1, %s867_s22  ;;  %s798_s22 = sshll.u32 %s875_s7, 4  ;;  %s799_s22 = int_to_ptr.vmem [resolvable:$false] %s798_s22 }
  0x51   : > { %p801_p5 = scmp.lt.s32.totalorder %s1041_s5, %s799_s22 }
  0x54   : > { %284 = vrot.lane.b32.xlu0 %v194_v1, %s868_s8  ;;  %307 = vrot.lane.b32.xlu1 %v195_v0, %s869_s9  ;;  %s800_s8 = scalar_lea.vmem %s799_s22, 768 }
  0x55   : > { %p802_p10 = scmp.lt.s32.totalorder %s800_s8, %s794_s29 }
  0x57   : > { %p803_p2 = por %p802_p10, %p801_p5 }
  0x58   : > { %309 = vrot.lane.b32.xlu0 %v196_v2, %s869_s9  ;;  %328 = vrot.lane.b32.xlu1 %v195_v0, %s870_s10 }
  0x59   : > { %p804_p4 = pnand %p803_p2, %p797_p13 }
  0x5c   : > { %330 = vrot.lane.b32.xlu0 %v196_v2, %s870_s10  ;;  %305 = vrot.lane.b32.xlu1 %v194_v1, %s869_s9 }
  0x60   : > { %326 = vrot.lane.b32.xlu0 %v194_v1, %s870_s10  ;;  %349 = vrot.lane.b32.xlu1 %v195_v0, %s873_s11 }
  0x64   : > { %351 = vrot.lane.b32.xlu0 %v196_v2, %s873_s11  ;;  %347 = vrot.lane.b32.xlu1 %v194_v1, %s873_s11 }
  0x68   : > { %393 = vperm.xlu0 %763, %v390_v6  }
  0xaa   : > { %v203_v7 = vpop.permute.xlu0 %202  ;;  %v201_v8 = vpop.permute.xlu1 %200 }
  0xab   : > { %v207_v9 = vsel %vm206_vm2, %v201_v8, %v203_v7 }
  0xac   : > { %v675_v14 = vpack.c.bf16 %v207_v9, %v194_v1 }
  0xae   : > { %v205_v10 = vpop.permute.xlu0 %204  ;;  %v224_v11 = vpop.permute.xlu1 %223 }
  0xaf   : > { %v208_v12 = vsel %vm206_vm2, %v203_v7, %v205_v10  ;;  %214 = vst.msk [vmem:[#allocation2 + $0x28] sm:$0xff] %vm192_vm0, %v205_v10 }
  0xb0   : > { %v673_v13 = vpack.c.bf16 %v208_v12, %v195_v0 }
  0xb2   : > { %v226_v15 = vpop.permute.xlu0 %225  ;;  %v245_v16 = vpop.permute.xlu1 %244  ;;  %674 = vmatprep.subr.bf16.mxu0 %v673_v13 }
  0xb3   : > { %v229_v17 = vsel %vm227_vm3, %v224_v11, %v226_v15  ;;  %235 = vst.msk [vmem:[#allocation2 + $0x40] sm:$0xff] %vm192_vm0, %v226_v15  ;;  %676 = vmatpush1.bf16.msra.mxu0 %v675_v14 }
  0xb6   : > { %v247_v19 = vpop.permute.xlu0 %246  ;;  %v222_v20 = vpop.permute.xlu1 %221  ;;  %v368_v21 = vld [vmem:[#allocation2 + $0x28] sm:$0xff] }
  0xb7   : > { %v250_v22 = vsel %vm248_vm4, %v245_v16, %v247_v19  ;;  %256 = vst.msk [vmem:[#allocation2 + $0x58] sm:$0xff] %vm192_vm0, %v247_v19  ;;  %v228_v23 = vsel %vm227_vm3, %v222_v20, %v224_v11  ;;  %v690_v24 = vpack.c.bf16 %v368_v21, %v365_v18 }
  0xb8   : > { %v677_v25 = vpack.c.bf16 %v250_v22, %v229_v17 }
  0xb9   : > { %691 = vmatpush3.bf16.msra.mxu1 %v690_v24 }
  0xba   : > { %v243_v26 = vpop.permute.xlu0 %242  ;;  %v266_v27 = vpop.permute.xlu1 %265  ;;  %692 = vmatprep.subr.bf16.mxu1 %v864_v3  ;;  %678 = vmatprep.subr.bf16.mxu0 %v677_v25  ;;  %v371_v32 = vld [vmem:[#allocation2 + $0x40] sm:$0xff] }
  0xbb   : > { %v249_v28 = vsel %vm248_vm4, %v243_v26, %v245_v16 }
  0xbc   : > { %v679_v29 = vpack.c.bf16 %v249_v28, %v228_v23 }
  0xbe   : > { %v268_v30 = vpop.permute.xlu0 %267  ;;  %v287_v31 = vpop.permute.xlu1 %286  ;;  %v374_v33 = vld [vmem:[#allocation2 + $0x58] sm:$0xff]  ;;  %680 = vmatpush1.bf16.msra.mxu0 %v679_v29 }
  0xbf   : > { %v271_v34 = vsel %vm269_vm5, %v266_v27, %v268_v30  ;;  %277 = vst.msk [vmem:[#allocation2 + $0x70] sm:$0xff] %vm192_vm0, %v268_v30  ;;  %v693_v35 = vpack.c.bf16 %v374_v33, %v371_v32 }
  0xc1   : > { %694 = vmatpush3.bf16.msra.mxu1 %v693_v35 }
  0xc2   : > { %v289_v36 = vpop.permute.xlu0 %288  ;;  %v264_v37 = vpop.permute.xlu1 %263  ;;  %695 = vmatprep.subr.bf16.mxu1 %v864_v3 }
  0xc3   : > { %v292_v38 = vsel %vm290_vm6, %v287_v31, %v289_v36  ;;  %298 = vst.msk [vmem:[#allocation2 + $0x88] sm:$0xff] %vm192_vm0, %v289_v36  ;;  %v270_v39 = vsel %vm269_vm5, %v264_v37, %v266_v27 }
  0xc4   : > { %v681_v40 = vpack.c.bf16 %v292_v38, %v271_v34 }
  0xc6   : > { %v285_v41 = vpop.permute.xlu0 %284  ;;  %v308_v42 = vpop.permute.xlu1 %307  ;;  %682 = vmatprep.subr.bf16.mxu0 %v681_v40  ;;  %v377_v47 = vld [vmem:[#allocation2 + $0x70] sm:$0xff] }
  0xc7   : > { %v291_v43 = vsel %vm290_vm6, %v285_v41, %v287_v31 }
  0xc8   : > { %v683_v44 = vpack.c.bf16 %v291_v43, %v270_v39 }
  0xca   : > { %v310_v45 = vpop.permute.xlu0 %309  ;;  %v329_v46 = vpop.permute.xlu1 %328  ;;  %v380_v48 = vld [vmem:[#allocation2 + $0x88] sm:$0xff]  ;;  %684 = vmatpush1.bf16.msra.mxu0 %v683_v44 }
  0xcb   : > { %v313_v49 = vsel %vm311_vm7, %v308_v42, %v310_v45  ;;  %319 = vst.msk [vmem:[#allocation2 + $0xa0] sm:$0xff] %vm192_vm0, %v310_v45  ;;  %v696_v50 = vpack.c.bf16 %v380_v48, %v377_v47 }
  0xcd   : > { %697 = vmatpush3.bf16.msra.mxu1 %v696_v50 }
  0xce   : > { %v331_v51 = vpop.permute.xlu0 %330  ;;  %v306_v52 = vpop.permute.xlu1 %305  ;;  %698 = vmatprep.subr.bf16.mxu1 %v864_v3  ;;  %v362_v3 = vld [vmem:[%s1085_s1] sm:$0xff] }
  0xcf   : > { %v334_v53 = vsel %vm332_vm8, %v329_v46, %v331_v51  ;;  %340 = vst.msk [vmem:[#allocation2 + $0xb8] sm:$0xff] %vm192_vm0, %v331_v51  ;;  %v312_v54 = vsel %vm311_vm7, %v306_v52, %v308_v42 }
  0xd0   : > { %v685_v55 = vpack.c.bf16 %v334_v53, %v313_v49 }
  0xd2   : > { %v327_v56 = vpop.permute.xlu0 %326  ;;  %v350_v57 = vpop.permute.xlu1 %349  ;;  %686 = vmatprep.subr.bf16.mxu0 %v685_v55  ;;  %v383_v62 = vld [vmem:[#allocation2 + $0xa0] sm:$0xff] }
  0xd3   : > { %v333_v58 = vsel %vm332_vm8, %v327_v56, %v329_v46 }
  0xd4   : > { %v687_v59 = vpack.c.bf16 %v333_v58, %v312_v54 }
  0xd6   : > { %v352_v60 = vpop.permute.xlu0 %351  ;;  %v348_v61 = vpop.permute.xlu1 %347  ;;  %v386_v63 = vld [vmem:[#allocation2 + $0xb8] sm:$0xff]  ;;  %688 = vmatpush1.bf16.msra.mxu0 %v687_v59 }
  0xd7   : > { %v355_v0 = vsel %vm353_vm9, %v350_v57, %v352_v60  ;;  %361 = vst.msk [vmem:[#allocation2 + $0xd0] sm:$0xff] %vm192_vm0, %v352_v60  ;;  %v354_v1 = vsel %vm353_vm9, %v348_v61, %v350_v57  ;;  %v699_v2 = vpack.c.bf16 %v386_v63, %v383_v62 }
  0xd8   : > { %416 = vmatprep.subr.mxu0 %v355_v0 }
  0xd9   : > { %700 = vmatpush3.bf16.msra.mxu1 %v699_v2 }
  0xda   : > { %668 = vmatprep.subr.mxu1 %v871_v4  ;;  %417 = vmatpush1.msra.mxu0 %v354_v1 }
  0xdb   : > { %637 = vmatmul.mubr.msk.f32.vlgmr.msra.gmra.mrb[0].mxu0 %vm396_vm10, %v362_v3 }
  0xde   : > { %v389_v5 = vld [vmem:[#allocation2 + $0xd0] sm:$0xff] }
  0xdf   : > { %669 = vmatpush3.msra.mxu1 %v389_v5 }
  0xe0   : > { %671 = vmatmul.mubr.msk.f32.vlgmr.msra.gmra.mrb[0].mxu1 %vm396_vm10, %v362_v3 }
  0xe7   : > { %v394_v6 = vpop.permute.xlu0 %393 }
 0x1ae   : > { %v466_v7 = vpop.f32.mrb[0].mxu0 }
 0x1af   : > { %v467_v8 = vadd.f32 %v466_v7, %v394_v6  ;;  %v468_v9 = vpop.f32.mrb[1].mxu0 }
 0x1b0   : > { %v469_v10 = vadd.f32 %v468_v9, %v394_v6 }
 0x1b1   : > { %v541_v11 = vmax.f32 %v467_v8, 0.0 }
 0x1b2   : > { %v542_v12 = vmax.f32 %v469_v10, 0.0 }
 0x1b3   : > { %544 = vst [vmem:[%s186_s27] sm:$0xff] %v541_v11  ;;  %v537_v13 = vpop.f32.mrb[0].mxu1 }
 0x1b4   : > { %v538_v4 = vadd.f32 %v537_v13, %v394_v6  ;;  %545 = vst [vmem:[%s186_s27 + $0x8] sm:$0xff] %v542_v12  ;;  %v672_v14 = vpop.f32.mrb[1].mxu1 }
 0x1b6   : > { %v543_v15 = vmax.f32 %v538_v4, 0.0 }
 0x1b8   : > { %546 = vst.msk [vmem:[%s186_s27 + $0x10] sm:$0xff] %vm192_vm0, %v543_v15 }
 0x1b9   : > { %807 = shalt.err (!%p804_p4)
}
 0x1ba   : > { %s808_s28 = scalar_lea.hbm %s1039_s6, 384  ;;  %s812_s11 = scalar_lea.hbm %s1087_s3, 768 }
 0x1bb   : > { %p809_p7 = scmp.ne.s32.totalorder %s1039_s6, %s808_s28  ;;  %p813_p0 = scmp.lt.u32.totalorder %s1039_s6, %s1087_s3 }
 0x1bc   : > { %p814_p1 = scmp.lt.u32.totalorder %s812_s11, %s808_s28  ;;  %p816_p6 = scmp.lt.u32.totalorder %s808_s28, %s1039_s6 }
 0x1bd   : > { %p810_p8 = pnand %p809_p7, %p1095_p11 }
 0x1be   : > { %p815_p3 = por %p814_p1, %p813_p0 }
 0x1bf   : > { %p811_p9 = pneg %p810_p8 }
 0x1c0   : > { %p817_p12 = por %p816_p6, %p815_p3 }
 0x1c2   : > { %p818_p13 = pnand %p817_p12, %p811_p9 }
 0x1c4   : > { %821 = shalt.err (!%p818_p13)
}
 0x1c5   : > { %707 = dma.vmem_to_hbm [thread:$0]  (%p1095_p11), %s1041_s5, 384, %s1039_s6, %s548_s16  }
 0x1c6 PF: > { %s574_s20 = sand.u32 1, %s848_s12   ;;  %p1096_p5 = scmp.ne.s32.totalorder %s1091_s24, 0 }
 0x1c7   : > { %p1097_p10 = scmp.ge.s32.totalorder %s860_s15, 2  ;;  %s575_s25 = scalar_lea.sflag [#allocation5], %s574_s20 }
 0x1c9   : > { %p714_p2 = pnand %p1097_p10, %p1096_p5 }
 0x1cb   : > { %843 = dma.done.wait (!%p714_p2), %s575_s25, 384  }
 0x1cc   : > { %845 = vsyncadd (!%p714_p2), %s575_s25, 4294966912  ;;  %p16_p4 = scmp.ge.s32.totalorder %s921_s18, 4   ;;  %s1098_s12 = smov %s852_s13 }
 0x1cd   : > { %s1099_s13 = smov %s856_s14  ;;  %s1100_s14 = smov %s933_s21 }
 0x1ce   : > { %s1101_s15 = smov %s921_s18  ;;  %18 = sbr.rel (!%p16_p4) target bundleno = 5 (0x5), region = 77 }
 0x1d5   :  { %580 = vsyncpa [#allocation4], 1 }
 0x1d6   :  { %582 = vsyncpa [#allocation4 + $0x1], 1 }
 0x1d7   :  { %583 = vsyncpa [#allocation5], 1 }
 0x1d8   :  { %585 = vsyncpa [#allocation5 + $0x1], 1 }

</bundles_post_ra>
